<compile_context>
chip_gen: v7x
topology: tpu7x:2x2x1
jax: 0.10.0
libtpu: 0.0.40
codegen_flags: <defaults>
</compile_context>

<pallas_src>
import jax
import jax.numpy as jnp
from jax.experimental import pallas as pl
from jax.experimental.pallas import tpu as pltpu

# Target lane-tile size (multiple of 128).  Per-tile VMEM is tiny
# (~(Cin+Cout)*T*4 bytes, double-buffered), so 8192 lanes fits comfortably in
# v7x's 64 MiB VMEM while amortizing the ~0.35us per-grid-step overhead.
_LANE_TILE_TARGET = 8192


def skip_conv_kernel(x_ref, w_ref, b_ref, o_ref):
    # x_ref: (1, Cin, T) skip features, spatial in the lane axis
    # w_ref: (Cout, 2*Cin) full conv weight (log-branch cols first)
    # b_ref: (Cout, 1) bias (broadcast over lanes)
    # o_ref: (1, Cout, T)
    x = x_ref[0, :, :].astype(jnp.float32)              # (Cin, T)
    x_log = jnp.log(x * x + 0.01)                       # VPU mul/add + EUP log
    x_cat = jnp.concatenate([x_log, x], axis=0)         # (2*Cin, T) in-register concat
    acc = jnp.dot(w_ref[...], x_cat,
                  preferred_element_type=jnp.float32)   # single fused MXU dot
    o_ref[0, :, :] = (acc + b_ref[...]).astype(o_ref.dtype)


def skip_conv(x_input, x_skip, weight, bias):
    """x_input, x_skip: (N, Cin, H, W) NCHW. weight: (Cout, 2*Cin). bias: (Cout,)."""
    del x_input  # overwritten inside the PyTorch forward; unused
    N, Cin, H, W = x_skip.shape
    Cout = weight.shape[0]
    HW = H * W

    # Free reshapes only (NCHW is contiguous); no HBM transposes.
    x3d = x_skip.reshape(N, Cin, HW)
    w = weight.astype(jnp.float32)                 # (Cout, 2*Cin)
    b = bias.reshape(Cout, 1).astype(jnp.float32)  # (Cout, 1)

    # Lane tile: full spatial extent if it is small, else a 128-aligned tile.
    if HW <= _LANE_TILE_TARGET:
        T = HW
    else:
        T = _LANE_TILE_TARGET
    grid = (N, pl.cdiv(HW, T))

    itemsize = jnp.dtype(x_skip.dtype).itemsize
    M = N * HW
    cost = pl.CostEstimate(
        flops=2 * M * (2 * Cin) * Cout + 2 * M * Cin,
        transcendentals=M * Cin,
        bytes_accessed=(M * Cin * itemsize            # read x_skip
                        + M * Cout * itemsize         # write out
                        + Cout * 2 * Cin * 4          # weight
                        + Cout * 4),                  # bias
    )

    out3d = pl.pallas_call(
        skip_conv_kernel,
        out_shape=jax.ShapeDtypeStruct((N, Cout, HW), x_skip.dtype),
        grid_spec=pl.GridSpec(
            grid=grid,
            in_specs=[
                pl.BlockSpec((1, Cin, T), lambda n, j: (n, 0, j)),       # x tiles
                pl.BlockSpec((Cout, 2 * Cin), lambda n, j: (0, 0)),      # weight (resident)
                pl.BlockSpec((Cout, 1), lambda n, j: (0, 0)),            # bias (resident)
            ],
            out_specs=pl.BlockSpec((1, Cout, T), lambda n, j: (n, 0, j)),
        ),
        compiler_params=pltpu.CompilerParams(
            dimension_semantics=("parallel", "parallel")),
        cost_estimate=cost,
    )(x3d, w, b)

    return out3d.reshape(N, Cout, H, W)


if __name__ == "__main__":
    key = jax.random.PRNGKey(0)
    k1, k2, k3, k4 = jax.random.split(key, 4)

    N, Cin, H, W = 2, 4, 16, 16
    Cout = 8

    x_input = jax.random.normal(k1, (N, Cin, H, W), dtype=jnp.float32)
    x_skip = jax.random.normal(k2, (N, Cin, H, W), dtype=jnp.float32)

    # Deterministic synthetic conv parameters (Conv2d(2*Cin, Cout, 1))
    weight = jax.random.normal(k3, (Cout, 2 * Cin), dtype=jnp.float32) * 0.1
    bias = jax.random.normal(k4, (Cout,), dtype=jnp.float32) * 0.1

    out = jax.block_until_ready(skip_conv(x_input, x_skip, weight, bias))

    # Pure-JAX reference of the same math (concat + 1x1 conv as einsum)
    x_log = jnp.log(x_skip**2 + 0.01)
    x_cat = jnp.concatenate([x_log, x_skip], axis=1)               # (N, 2*Cin, H, W)
    ref = jnp.einsum("nchw,oc->nohw", x_cat, weight) + bias[None, :, None, None]

    assert out.shape == (N, Cout, H, W)
    assert jnp.allclose(out, ref, atol=1e-4, rtol=1e-4)
    print("KERNEL_OK")
</pallas_src>

<mosaic_0001>
module attributes {stable_mosaic.version = 11 : i64} {
  func.func @skip_conv_kernel(%arg0: i32, %arg1: i32, %arg2: memref<1x4x256xf32, #tpu.memory_space<vmem>>, %arg3: memref<8x8xf32, #tpu.memory_space<vmem>>, %arg4: memref<8x1xf32, #tpu.memory_space<vmem>>, %arg5: memref<1x8x256xf32, #tpu.memory_space<vmem>>) attributes {dimension_semantics = [#tpu.dimension_semantics<parallel>, #tpu.dimension_semantics<parallel>], iteration_bounds = array<i64: 2, 1>, scalar_prefetch = 0 : i64, scratch_operands = 0 : i64, tpu.core_type = #tpu.core_type<tc>, window_params = [{transform_indices = @transform_0, window_bounds = array<i64: 1, 4, 256>}, {pipeline_mode = #tpu.pipeline_mode<synchronous>, transform_indices = @transform_1, window_bounds = array<i64: 8, 8>}, {pipeline_mode = #tpu.pipeline_mode<synchronous>, transform_indices = @transform_2, window_bounds = array<i64: 8, 1>}, {transform_indices = @transform_3, window_bounds = array<i64: 1, 8, 256>}]} {
    %c0 = arith.constant 0 : index
    %c0_0 = arith.constant 0 : index
    %c0_1 = arith.constant 0 : index
    %0 = vector.load %arg2[%c0, %c0_0, %c0_1] : memref<1x4x256xf32, #tpu.memory_space<vmem>>, vector<1x4x256xf32>
    %1 = vector.shape_cast %0 : vector<1x4x256xf32> to vector<4x256xf32>
    %2 = arith.mulf %1, %1 : vector<4x256xf32>
    %cst = arith.constant 0.00999999977 : f32
    %3 = vector.broadcast %cst : f32 to vector<4x256xf32>
    %4 = arith.addf %2, %3 : vector<4x256xf32>
    %5 = math.log %4 : vector<4x256xf32>
    %6 = tpu.concatenate %5, %1 in 0 : vector<4x256xf32>, vector<4x256xf32> -> vector<8x256xf32>
    %c0_2 = arith.constant 0 : index
    %c0_3 = arith.constant 0 : index
    %7 = vector.load %arg3[%c0_2, %c0_3] : memref<8x8xf32, #tpu.memory_space<vmem>>, vector<8x8xf32>
    %cst_4 = arith.constant dense<0.000000e+00> : vector<8x256xf32>
    %8 = tpu.matmul %7, %6, %cst_4 {dimension_numbers = #tpu.dot_dimension_numbers<[1], [0], [0], [1], [0, 0, 1, 1], [], []>} : vector<8x8xf32>, vector<8x256xf32>, vector<8x256xf32> -> vector<8x256xf32>
    %c0_5 = arith.constant 0 : index
    %c0_6 = arith.constant 0 : index
    %9 = vector.load %arg4[%c0_5, %c0_6] : memref<8x1xf32, #tpu.memory_space<vmem>>, vector<8x1xf32>
    %10 = vector.broadcast %9 : vector<8x1xf32> to vector<8x256xf32>
    %11 = arith.addf %8, %10 : vector<8x256xf32>
    %c0_7 = arith.constant 0 : index
    %c0_8 = arith.constant 0 : index
    %c0_9 = arith.constant 0 : index
    %12 = vector.load %arg5[%c0_7, %c0_8, %c0_9] : memref<1x8x256xf32, #tpu.memory_space<vmem>>, vector<1x8x256xf32>
    %13 = vector.shape_cast %12 : vector<1x8x256xf32> to vector<8x256xf32>
    %14 = vector.shape_cast %11 : vector<8x256xf32> to vector<1x8x256xf32>
    tpu.vector_store %arg5[%c0_7, %c0_8, %c0_9], %14 {strides = array<i32>} : memref<1x8x256xf32, #tpu.memory_space<vmem>>, vector<1x8x256xf32>,
    return
  }
  func.func @transform_0(%arg0: i32, %arg1: i32) -> (i32, i32, i32) {
    %c0_i32 = arith.constant 0 : i32
    %c0_i32_0 = arith.constant 0 : i32
    return %arg0, %c0_i32, %arg1 : i32, i32, i32
  }
  func.func @transform_1(%arg0: i32, %arg1: i32) -> (i32, i32) {
    %c0_i32 = arith.constant 0 : i32
    %c0_i32_0 = arith.constant 0 : i32
    %c0_i32_1 = arith.constant 0 : i32
    return %c0_i32, %c0_i32_0 : i32, i32
  }
  func.func @transform_2(%arg0: i32, %arg1: i32) -> (i32, i32) {
    %c0_i32 = arith.constant 0 : i32
    %c0_i32_0 = arith.constant 0 : i32
    %c0_i32_1 = arith.constant 0 : i32
    return %c0_i32, %c0_i32_0 : i32, i32
  }
  func.func @transform_3(%arg0: i32, %arg1: i32) -> (i32, i32, i32) {
    %c0_i32 = arith.constant 0 : i32
    %c0_i32_0 = arith.constant 0 : i32
    return %arg0, %c0_i32, %arg1 : i32, i32, i32
  }
}

</mosaic_0001>

<bundles_post_ra>
// kernel: tpu_custom_call.1
= control target key start
LH: loop header
LB: loop body
LE: loop exit
PB: predicated region body
PF: predicated region fallthrough
CT: control target
= control target key end

     0   :  { %8 = vsyncpa [#allocation3], 0  ;;  %s809_s0 = inlined_call_operand.hbm [shape: f32[2,4,256], index: 0, kind: input, shape index: {}]   ;;  %s810_s1 = inlined_call_operand.vmem [shape: f32[8,8], index: 1, kind: input, shape index: {}]   ;;  %s811_s2 = inlined_call_operand.vmem [shape: f32[8,1], index: 2, kind: input, shape index: {}]   ;;  %s812_s3 = inlined_call_operand.hbm [shape: f32[2,8,256], index: 3, kind: output, shape index: {}]  }
   0x1   :  { %10 = vsyncpa [#allocation3 + $0x1], 0 }
   0x2   :  { %11 = vsyncpa [#allocation4], 0 }
   0x3   :  { %13 = vsyncpa [#allocation4 + $0x1], 0  ;;  %s630_s12 = smov 0   ;;  %s632_s13 = smov 0  }
   0x4   :  { %s634_s14 = smov 0   ;;  %s636_s15 = smov 0  }
   0x5   :  { %s638_s16 = smov 0   ;;  %s640_s17 = smov 0  }
   0x6 LB: > { %s406_s18 = sadd.s32 4294967295, %s604_s17   ;;  %s407_s19 = sadd.s32 4294967294, %s604_s17   ;;  %s604_s17 = sphi %s640_s17, %s19_s17   ;;  %s600_s16 = sphi %s638_s16, %s828_s16   ;;  %s596_s15 = sphi %s636_s15, %s827_s15   ;;  %s592_s14 = sphi %s634_s14, %s826_s14   ;;  %s588_s13 = sphi %s632_s13, %s825_s13   ;;  %s584_s12 = sphi %s630_s12, %s824_s12  }
   0x7   : > { %s31_s20 = sadd.s32 1, %s600_s16  ;;  %s40_s21 = sadd.s32 1, %s592_s14 }
   0x8   : > { %p33_p0 = scmp.ge.s32.totalorder %s31_s20, 2  ;;  %p47_p1 = scmp.ne.s32.totalorder %s592_s14, %s588_s13 }
   0x9   : > { %p48_p2 = scmp.eq.s32.totalorder %s604_s17, 0  ;;  %p53_p3 = scmp.ne.s32.totalorder %s588_s13, %s584_s12 }
   0xa   : > { %s830_s20 = smov (%p33_p0, %s31_s20), 0  ;;  %p54_p5 = scmp.eq.s32.totalorder %s406_s18, 0 }
   0xb   : > { %p671_p4 = por %p48_p2, %p47_p1  ;;  %s35_s23 = ssub.s32 %s600_s16, %s830_s20 }
   0xc   : > { %p121_p6 = scmp.eq.s32.totalorder %s406_s18, 1  ;;  %p38_p7 = scmp.eq.s32.totalorder %s35_s23, 0 }
   0xd   : > { %p677_p8 = por %p54_p5, %p53_p3  ;;  %p127_p10 = scmp.eq.s32.totalorder %s407_s19, 1 }
   0xe   : > { %p681_p9 = por %p121_p6, %p47_p1  ;;  %p436_p13 = scmp.lt.s32.totalorder %s604_s17, 2 }
   0xf   : > { %s686_s26 = scalar_select %p38_p7, %s592_s14, %s40_s21  }
  0x10   : > { %s816_s25 = scalar_select %p681_p9, 1, 0 }
  0x11   : > { %p688_p11 = por %p127_p10, %p53_p3  ;;  %s153_s28 = sand.u32 1, %s592_s14  }
  0x12   : > { %s410_s29 = sshll.u32 %s153_s28, 3  ;;  %s422_s30 = sshll.u32 %s600_s16, 7 }
  0x13   : > { %s817_s27 = scalar_select %p688_p11, 1, 0 }
  0x14   : > { %s699_s6 = scalar_lea.hbm %s809_s0, %s422_s30  ;;  %s157_s7 = scalar_lea.vmem [#allocation2], %s410_s29 }
  0x15   : > { %s167_s8 = sshll.u32 %s157_s7, 4  ;;  %p705_p0 = pnand %p436_p13, %p671_p4  ;;  %s701_s8 = int_to_ptr.vmem [resolvable:$true] %s167_s8 }
  0x16   : > { %s154_s10 = scalar_lea.sflag [#allocation3], %s153_s28  ;;  %s492_s11 = scalar_lea.hbm %s699_s6, 128 }
  0x17   : > { %p493_p3 = scmp.ne.s32.totalorder %s699_s6, %s492_s11  ;;  %p494_p5 = pneg %p705_p0 }
  0x18   : > { %s497_s21 = scalar_lea.hbm %s809_s0, 256  ;;  %p498_p4 = scmp.lt.u32.totalorder %s699_s6, %s809_s0 }
  0x19   : > { %p495_p6 = pnand %p494_p5, %p493_p3  ;;  %p499_p10 = scmp.lt.u32.totalorder %s497_s21, %s492_s11 }
  0x1a   : > { %p501_p12 = scmp.lt.u32.totalorder %s492_s11, %s699_s6 }
  0x1b   : > { %p496_p7 = pneg %p495_p6  ;;  %p500_p13 = por %p499_p10, %p498_p4 }
  0x1d   : > { %p502_p1 = por %p501_p12, %p500_p13 }
  0x1f   : > { %p503_p2 = pnand %p502_p1, %p496_p7 }
  0x21   : > { %506 = shalt.err (!%p503_p2)
}
  0x22   : > { %s507_s28 = scalar_lea.vmem %s701_s8, 128  ;;  %s606_s29 = smov [#allocation2]  }
  0x23   : > { %p508_p3 = scmp.ne.s32.totalorder %s701_s8, %s507_s28  ;;  %s512_s30 = sshll.u32 %s606_s29, 4  ;;  %s513_s30 = int_to_ptr.vmem [resolvable:$false] %s512_s30 }
  0x24   : > { %s514_s4 = scalar_lea.vmem %s513_s30, 256  ;;  %p515_p9 = scmp.lt.s32.totalorder %s701_s8, %s513_s30 }
  0x25   : > { %p510_p6 = pnand %p508_p3, %p494_p5  ;;  %p516_p4 = scmp.lt.s32.totalorder %s514_s4, %s507_s28 }
  0x27   : > { %p511_p11 = pneg %p510_p6  ;;  %p517_p10 = por %p516_p4, %p515_p9 }
  0x29   : > { %p518_p12 = pnand %p517_p10, %p511_p11 }
  0x2b   : > { %521 = shalt.err (!%p518_p12)
}
  0x2c   : > { %431 = dma.hbm_to_vmem [thread:$0]  (!%p705_p0), %s699_s6, 128, %s701_s8, %s154_s10  }
  0x2d   : > { %p819_p1 = scmp.lt.s32.totalorder %s604_s17, 3  ;;  %p820_p2 = scmp.ge.s32.totalorder %s604_s17, 1 }
  0x2f   : > { %p173_p5 = pnand %p820_p2, %p819_p1 }
  0x30   : > { %s741_s5 = sand.u32 (!%p173_p5), 1, %s588_s13  }
  0x31   : > { %176 = sbr.rel (%p173_p5) target bundleno = 309 (0x135), region = 32  ;;  %s414_s7 = sshll.u32 (!%p173_p5), %s741_s5, 3 }
  0x32   : > { %s179_s11 = scalar_lea.sflag (!%p173_p5), [#allocation3], %s741_s5  ;;  %s182_s18 = scalar_lea.vmem (!%p173_p5), [#allocation2], %s414_s7 }
  0x38   : > { %575 = dma.done.wait (%p677_p8), %s179_s11, 128  }
  0x39   : > { %577 = vsyncadd (%p677_p8), %s179_s11, 4294967168  ;;  %v607_v0 = vmov 0.0   ;;  %v608_v1 = vmov 0   ;;  %v207_v2 = vld [vmem:[%s182_s18] sm:$0xff]  ;;  %vm218_vm0 = vcmask 1043456   ;;  %vm228_vm1 = vcmask 64512  }
  0x3a   : > { %296 = vmatprep.mubr.f32.mxu0 %v607_v0  ;;  %488 = vset.pattern.permute.xlu0 %v608_v1  ;;  %v222_v3 = vld [vmem:[%s811_s2] sm:$0xff]  ;;  %v208_v4 = vmul.f32 %v207_v2, %v207_v2  ;;  %v216_v7 = vcombine.low %v207_v2, %v207_v2  ;;  %s415_s10 = sshll.u32 %s741_s5, 4  ;;  %s423_s19 = sshll.u32 %s596_s15, 8 }
  0x3b   : > { %225 = vperm.xlu0 %488, %v222_v3   ;;  %v221_v12 = vld [vmem:[%s810_s1] sm:$0xff]  ;;  %s204_s21 = scalar_lea.vmem [#allocation5], %s415_s10  ;;  %s760_s29 = scalar_lea.hbm %s812_s3, %s423_s19 }
  0x3c   : > { %v209_v5 = vadd.f32 0.01, %v208_v4  ;;  %s322_s22 = sshll.u32 %s204_s21, 4  ;;  %s306_s30 = scalar_lea.sflag [#allocation4], %s741_s5  ;;  %s762_s22 = int_to_ptr.vmem [resolvable:$true] %s322_s22 }
  0x3d   : > { %s522_s15 = scalar_lea.vmem %s762_s22, 256  ;;  %p821_p9 = scmp.ne.s32.totalorder %s816_s25, 0 }
  0x3e   : > { %490 = vlog2.f32 %v209_v5  ;;  %p523_p8 = scmp.ne.s32.totalorder %s762_s22, %s522_s15  ;;  %s609_s4 = smov [#allocation5]  }
  0x3f   : > { %s526_s7 = sshll.u32 %s609_s4, 4  ;;  %s527_s7 = int_to_ptr.vmem [resolvable:$false] %s526_s7 }
  0x40   : > { %p524_p11 = pnand %p523_p8, %p821_p9  ;;  %s528_s11 = scalar_lea.vmem %s527_s7, 512 }
  0x41   : > { %p529_p7 = scmp.lt.s32.totalorder %s762_s22, %s527_s7  ;;  %p530_p13 = scmp.lt.s32.totalorder %s528_s11, %s522_s15 }
  0x42   : > { %p525_p0 = pneg %p524_p11 }
  0x43   : > { %p531_p3 = por %p530_p13, %p529_p7 }
  0x45   : > { %p532_p6 = pnand %p531_p3, %p525_p0 }
  0x48   : > { %v491_v6 = vpop.eup %490 }
  0x49   : > { %v211_v8 = vmul.f32 0.6931472, %v491_v6 }
  0x4b   : > { %v213_v9 = vcombine.high %v211_v8, %v211_v8  ;;  %v219_v10 = vsel %vm218_vm0, %v211_v8, %v216_v7 }
  0x4d   : > { %v220_v11 = vsel %vm218_vm0, %v213_v9, %v207_v2 }
  0x4e   : > { %232 = vmatprep.subr.mxu0 %v220_v11 }
  0x4f   : > { %233 = vmatpush1.msra.mxu0 %v219_v10 }
  0x50   : > { %416 = vmatmul.mubr.msk.f32.vlgmr.msra.gmra.mrb[0].mxu0 %vm228_vm1, %v221_v12 }
  0xba   : > { %v226_v13 = vpop.permute.xlu0 %225 }
 0x123   : > { %v298_v14 = vpop.f32.mrb[0].mxu0 }
 0x124   : > { %v299_v15 = vadd.f32 %v298_v14, %v226_v13  ;;  %v300_v16 = vpop.f32.mrb[1].mxu0 }
 0x125   : > { %v301_v17 = vadd.f32 %v300_v16, %v226_v13 }
 0x126   : > { %303 = vst [vmem:[%s204_s21] sm:$0xff] %v299_v15 }
 0x127   : > { %304 = vst [vmem:[%s204_s21 + $0x8] sm:$0xff] %v301_v17 }
 0x128   : > { %535 = shalt.err (!%p532_p6)
}
 0x129   : > { %s536_s5 = scalar_lea.hbm %s760_s29, 256  ;;  %s540_s8 = scalar_lea.hbm %s812_s3, 512 }
 0x12a   : > { %p537_p4 = scmp.ne.s32.totalorder %s760_s29, %s536_s5  ;;  %p541_p1 = scmp.lt.u32.totalorder %s760_s29, %s812_s3 }
 0x12b   : > { %p542_p2 = scmp.lt.u32.totalorder %s540_s8, %s536_s5  ;;  %p544_p8 = scmp.lt.u32.totalorder %s536_s5, %s760_s29 }
 0x12c   : > { %p538_p10 = pnand %p537_p4, %p821_p9 }
 0x12d   : > { %p543_p5 = por %p542_p2, %p541_p1 }
 0x12e   : > { %p539_p12 = pneg %p538_p10 }
 0x12f   : > { %p545_p11 = por %p544_p8, %p543_p5 }
 0x131   : > { %p546_p0 = pnand %p545_p11, %p539_p12 }
 0x133   : > { %549 = shalt.err (!%p546_p0)
}
 0x134   : > { %426 = dma.vmem_to_hbm [thread:$0]  (%p821_p9), %s762_s22, 256, %s760_s29, %s306_s30  }
 0x135 PF: > { %s334_s10 = sand.u32 1, %s584_s12   ;;  %p822_p7 = scmp.ne.s32.totalorder %s817_s27, 0 }
 0x136   : > { %p823_p13 = scmp.ge.s32.totalorder %s604_s17, 2  ;;  %s335_s19 = scalar_lea.sflag [#allocation4], %s334_s10 }
 0x138   : > { %p433_p3 = pnand %p823_p13, %p822_p7 }
 0x13a   : > { %579 = dma.done.wait (!%p433_p3), %s335_s19, 256  }
 0x13b   : > { %581 = vsyncadd (!%p433_p3), %s335_s19, 4294967040  ;;  %s19_s17 = sadd.s32 1, %s604_s17   ;;  %s824_s12 = smov %s588_s13 }
 0x13c   : > { %p16_p6 = scmp.ge.s32.totalorder %s19_s17, 4   ;;  %s825_s13 = smov %s592_s14 }
 0x13d   : > { %s826_s14 = smov %s686_s26  ;;  %s827_s15 = smov %s600_s16 }
 0x13e   : > { %s828_s16 = smov %s830_s20  ;;  %18 = sbr.rel (!%p16_p6) target bundleno = 6 (0x6), region = 77 }
 0x145   :  { %340 = vsyncpa [#allocation3], 1 }
 0x146   :  { %342 = vsyncpa [#allocation3 + $0x1], 1 }
 0x147   :  { %343 = vsyncpa [#allocation4], 1 }
 0x148   :  { %345 = vsyncpa [#allocation4 + $0x1], 1 }

</bundles_post_ra>
